<compile_context>
chip_gen: v7x
topology: tpu7x:2x2x1
jax: 0.10.0
libtpu: 0.0.40
codegen_flags: <defaults>
</compile_context>

<pallas_src>
import functools
import math

import numpy as np
import jax
import jax.numpy as jnp
from jax import lax
from jax.experimental import pallas as pl
from jax.experimental.pallas import tpu as pltpu


# --------------------------------------------------------------------------
# Pallas kernel: DoubleConv forward for a lane-packed block of `nb` images.
# Activations are (C, nb*HWp): channels on sublanes, packed spatial on lanes.
# --------------------------------------------------------------------------
def _dc_kernel(x_ref, w1_ref, w2_ref, b1f_ref, s2_ref, sh2f_ref, cb2_ref,
               eca_ref, tapm_ref, regm_ref, o_ref, stack_ref, *,
               W, HWp, Cin, Cout, nb, ipcpa, use_max, inv_region_count):
    f32 = jnp.float32
    nHW = nb * HWp

    # 3x3 tap offsets, kh-major / kw-minor (must match the (Cout, 9*C) im2col
    # weight layout built in the wrapper).
    taps = [(kh - 1, kw - 1) for kh in range(3) for kw in range(3)]

    # Hoisted per-step loads (shared by the whole lane-packed batch block).
    w1 = w1_ref[...]                                  # (Cout, 9*Cin), BN1 scale folded
    w2 = w2_ref[...]                                  # (Cout, 9*Cout)
    b1f = b1f_ref[...]                                # (Cout, 1) bn1 shift (+b1)
    cb2 = cb2_ref[...]                                # (Cout, 1) raw conv2 bias

    # Lane-pack the batch block: image b occupies lanes [b*HWp, (b+1)*HWp).
    # HWp is a multiple of 128, so this concat is lane-tile aligned (cheap).
    if nb > 1:
        x = jnp.concatenate([x_ref[b] for b in range(nb)], axis=1)  # (Cin, nHW)
    else:
        x = x_ref[0]

    def conv3x3(act, w_mat, c):
        """3x3 'same' conv as ONE fat matmul (Cout, 9c) @ (9c, nb*HWp).

        Shifted taps come from pltpu.roll along the packed lane axis (XLU slot)
        times a 0/1 validity mask (zero padding; the mask also zeroes every
        position whose roll wraps across a row / image / padding boundary).
        Taps are cast to the MXU dtype at store time, so the tap-stack scratch
        carries half the traffic of an f32 stack and is never zeroed (it is
        fully overwritten before every read).
        """
        for t, (dh, dw) in enumerate(taps):
            if dh == 0 and dw == 0:
                # Center tap needs no mask: x is zero in the padding lanes, and
                # h1's padding-lane values never reach a valid output or the
                # pooled region (all other taps are masked there).
                stack_ref[t * c:(t + 1) * c, :] = act.astype(stack_ref.dtype)
            else:
                # pltpu.roll follows np.roll: out[p] = in[(p - shift) % nHW];
                # we need in[p + dh*W + dw] (same image when the mask is 1).
                shift = (-(dh * W + dw)) % nHW
                stack_ref[t * c:(t + 1) * c, :] = (
                    pltpu.roll(act, shift, axis=1)
                    * tapm_ref[t][:c, :]).astype(stack_ref.dtype)
        return jnp.dot(w_mat, stack_ref[0:9 * c, :], preferred_element_type=f32)

    acc1 = conv3x3(x, w1, Cin)                        # conv1 (BN1 scale folded)
    h1 = jnp.maximum(acc1 + b1f, 0.0)                 # bn1 shift + relu1
    acc2 = conv3x3(h1, w2, Cout)                      # conv2 (bias deferred)

    if ipcpa:
        s2 = s2_ref[...]                              # (Cout, 1) bn2 scale
        sh2f = sh2f_ref[...]                          # (Cout, 1) bn2 shift (+b2)
        eca = eca_ref[...]                            # (Cout, Cout) banded ECA
        region = regm_ref[...]                        # (1, HWp) crop-window mask
        out1 = acc2 * s2 + sh2f                       # bn2(conv2 + bias), folded

        # Per-image epilogue: pooling / gate are (Cout, 1) columns, so this
        # tiny loop is negligible next to the packed conv work above.
        for b in range(nb):
            a_b = acc2[:, b * HWp:(b + 1) * HWp]
            if use_max:                               # AdaptiveMaxPool2d(1)
                pooled = jnp.max(jnp.where(region > 0.5, a_b, -jnp.inf),
                                 axis=1, keepdims=True)
            else:                                     # AdaptiveAvgPool2d(1)
                pooled = (jnp.sum(a_b * region, axis=1, keepdims=True)
                          * inv_region_count)
            sq = pooled + cb2                         # conv2 bias added post-pool
            # ECA Conv1d over channels as a tiny banded matvec; the gate is
            # computed once per channel, not once per pixel.
            y = jnp.dot(eca, sq, preferred_element_type=f32)      # (Cout, 1)
            gate = pl.reciprocal(1.0 + jnp.exp(-y), approx=True)  # sigmoid (EUP)
            o_ref[b] = jnp.maximum(
                out1[:, b * HWp:(b + 1) * HWp] * gate, 0.0)       # relu2
    else:
        # PyTorch quirk: bn2's output is discarded; relu2(conv2 + bias).
        res = jnp.maximum(acc2 + cb2, 0.0)
        for b in range(nb):
            o_ref[b] = res[:, b * HWp:(b + 1) * HWp]


# --------------------------------------------------------------------------
# Wrapper helpers
# --------------------------------------------------------------------------
def _crop_j(H, W):
    """Last `j` of PyTorch's IPCPA crop loop before `w == 2*j or h == 2*j`."""
    for j in range(64):
        if W == 2 * j or H == 2 * j:
            return j - 1
    return None


def _vmem_limit_bytes():
    """Per-generation VMEM budget (v5e/v6e: 128 MiB/TC, v7x: 64 MiB/TC)."""
    cap = None
    try:
        info = pltpu.get_tpu_info()
        cap = getattr(info, "vmem_capacity_bytes", None)
    except Exception:
        cap = None
    if not cap:
        cap = 64 * 1024 * 1024                    # conservative (v7x-sized) fallback
    return int(min(cap // 2, 64 * 1024 * 1024))


def _auto_batch_block(N, Cin, Cout, HWp, vmem_limit):
    """Largest batch block whose working set fits in half the VMEM budget while
    keeping the grid length >= 2, so v7x megacore can shard the batch axis."""
    maxC = max(Cin, Cout)
    best = 1
    for d in range(1, N + 1):
        if N % d:
            continue
        if N >= 2 and (N // d) < 2:
            continue                              # keep >= 2 grid steps (v7x)
        need = (2 * d * Cin * HWp * 4             # double-buffered x block
                + 2 * d * Cout * HWp * 4          # double-buffered out block
                + 9 * maxC * d * HWp * 2          # bf16 tap-stack scratch
                + 6 * d * Cout * HWp * 4)         # packed f32 temporaries
        if need <= vmem_limit // 2:
            best = d
    return best


# --------------------------------------------------------------------------
# Wrapper
# --------------------------------------------------------------------------
def double_conv_forward(x_nchw, p, IPCPA='False', batch_block=None):
    """x_nchw: (N, Cin, H, W) float32.  Returns (N, Cout, H, W) float32."""
    N, Cin, H, W = x_nchw.shape
    Cout = p['w1'].shape[-1]
    HW = H * W
    HWp = ((HW + 127) // 128) * 128               # lane-dense (unmasked stores)
    maxC = max(Cin, Cout)

    ipcpa = (IPCPA == 'True')
    use_max = not (p['a'] > p['e'])     # deterministic stand-in for rand draw

    vmem_limit = _vmem_limit_bytes()
    if batch_block is None:
        batch_block = _auto_batch_block(N, Cin, Cout, HWp, vmem_limit)
    if N % batch_block != 0:
        raise ValueError("batch_block must divide the batch size")
    nb = batch_block
    nHW = nb * HWp

    # bf16 MXU operands need even channel chunks for aligned packed-sublane
    # stores into the tap stack; fall back to f32 for odd channel counts.
    use_bf16 = (Cin % 2 == 0) and (Cout % 2 == 0)
    mxu_dtype = jnp.bfloat16 if use_bf16 else jnp.float32

    # ---- host-side static masks: 3x3 tap validity (zero padding + lane pad)
    rr = np.arange(H)[:, None]
    cc = np.arange(W)[None, :]
    tap_valid = np.zeros((9, HWp), np.float32)
    t = 0
    for kh in range(3):
        for kw in range(3):
            dh, dw = kh - 1, kw - 1
            valid = ((rr + dh >= 0) & (rr + dh < H) &
                     (cc + dw >= 0) & (cc + dw < W))
            tap_valid[t, :HW] = valid.reshape(HW).astype(np.float32)
            t += 1
    # Pre-tile to the packed lane width and pre-broadcast over channels so the
    # kernel never re-emits broadcast_in_dim (JAX does not CSE it).
    tap_masks = np.ascontiguousarray(
        np.broadcast_to(np.tile(tap_valid, (1, nb))[:, None, :],
                        (9, maxC, nHW)))

    # ---- IPCPA crop mask (rows j:W-j, cols j:H-j — PyTorch slice quirk)
    inv_region_count = 1.0
    region_mask = np.zeros((1, HWp), np.float32)
    region_mask[0, :HW] = 1.0
    if ipcpa:
        j = _crop_j(H, W)
        if j is None or j < 0:
            raise ValueError(
                "IPCPA='True' needs an even H or W in [2, 126] so the PyTorch "
                "crop loop terminates with a valid region")
        reg = ((rr >= j) & (rr < W - j) & (cc >= j) & (cc < H - j))
        cnt = float(reg.sum())
        if cnt < 1.0:
            raise ValueError("IPCPA crop region is empty for this (H, W)")
        inv_region_count = 1.0 / cnt
        region_mask = np.zeros((1, HWp), np.float32)
        region_mask[0, :HW] = reg.reshape(HW).astype(np.float32)

    # ---- lane-flattened (and lane-padded) input: NCHW -> (N, C, HWp)
    x_flat = jnp.asarray(x_nchw, jnp.float32).reshape(N, Cin, HW)
    if HWp != HW:
        x_flat = jnp.pad(x_flat, ((0, 0), (0, 0), (0, HWp - HW)))

    # ---- im2col weights (Cout, 9*C), tap-major / channel-minor.
    s1 = jnp.asarray(p['s1'], jnp.float32)
    w1_mat = jnp.transpose(jnp.asarray(p['w1'], jnp.float32),
                           (3, 0, 1, 2)).reshape(Cout, 9 * Cin)
    w1_mat = (w1_mat * s1[:, None]).astype(mxu_dtype)   # fold BN1 scale into conv1
    w2_mat = jnp.transpose(jnp.asarray(p['w2'], jnp.float32),
                           (3, 0, 1, 2)).reshape(Cout, 9 * Cout).astype(mxu_dtype)

    # ---- per-channel affine params as (Cout, 1) columns (f32 elementwise)
    col = lambda v: jnp.asarray(v, jnp.float32).reshape(-1, 1)
    b1fc = col(p['b1f'])
    s2c, cb2c = col(p['s2']), col(p['cb2'])
    sh2fc = col(p['sh2']) + s2c * cb2c        # fold conv2 bias into bn2 shift
    ecam = jnp.asarray(p['ecaM'], jnp.float32)

    kern = functools.partial(
        _dc_kernel, W=W, HWp=HWp, Cin=Cin, Cout=Cout, nb=nb,
        ipcpa=ipcpa, use_max=use_max, inv_region_count=inv_region_count)

    batch_map = lambda n: (n, 0, 0)
    full2 = lambda n: (0, 0)
    full3 = lambda n: (0, 0, 0)
    in_specs = [
        pl.BlockSpec((nb, Cin, HWp), batch_map),            # x
        pl.BlockSpec((Cout, 9 * Cin), full2),               # w1 (im2col, BN1 folded)
        pl.BlockSpec((Cout, 9 * Cout), full2),              # w2 (im2col)
        pl.BlockSpec((Cout, 1), full2),                     # bn1 shift (+b1)
        pl.BlockSpec((Cout, 1), full2),                     # bn2 scale
        pl.BlockSpec((Cout, 1), full2),                     # bn2 shift (+b2)
        pl.BlockSpec((Cout, 1), full2),                     # conv2 bias
        pl.BlockSpec((Cout, Cout), full2),                  # ECA band matrix
        pl.BlockSpec((9, maxC, nHW), full3),                # tap masks (pre-tiled)
        pl.BlockSpec((1, HWp), full2),                      # IPCPA crop mask
    ]

    out_flat = pl.pallas_call(
        kern,
        out_shape=jax.ShapeDtypeStruct((N, Cout, HWp), jnp.float32),
        grid_spec=pltpu.PrefetchScalarGridSpec(
            num_scalar_prefetch=0,
            grid=(N // nb,),
            in_specs=in_specs,
            out_specs=pl.BlockSpec((nb, Cout, HWp), batch_map),
            scratch_shapes=[pltpu.VMEM((9 * maxC, nHW), mxu_dtype)],
        ),
        compiler_params=pltpu.CompilerParams(
            dimension_semantics=("parallel",),   # batch axis: v7x megacore
            vmem_limit_bytes=vmem_limit),
    )(x_flat, w1_mat, w2_mat, b1fc, s2c, sh2fc, cb2c, ecam,
      jnp.asarray(tap_masks), jnp.asarray(region_mask))

    # (N, Cout, HWp) -> NCHW: drop lane padding, then a free reshape.
    out = out_flat[..., :HW] if HWp != HW else out_flat
    return out.reshape(N, Cout, H, W)


# --------------------------------------------------------------------------
# Deterministic parameter construction (shapes from the module's __init__)
# --------------------------------------------------------------------------
def _eca_kernel_size(channels, b=1, gamma=2):
    k = int(abs(math.log2(channels) / gamma + b / gamma))
    return k if k % 2 else k + 1


def init_params(key, in_channels, out_channels):
    Cin, Cout = in_channels, out_channels
    ks = jax.random.split(key, 13)
    eps = 1e-5

    w1 = jax.random.normal(ks[0], (3, 3, Cin, Cout), jnp.float32) * 0.1   # HWIO
    b1 = jax.random.normal(ks[1], (Cout,), jnp.float32) * 0.1
    g1 = 1.0 + 0.1 * jax.random.normal(ks[2], (Cout,), jnp.float32)
    be1 = 0.1 * jax.random.normal(ks[3], (Cout,), jnp.float32)
    m1 = 0.1 * jax.random.normal(ks[4], (Cout,), jnp.float32)
    v1 = jnp.abs(jax.random.normal(ks[5], (Cout,), jnp.float32)) + 0.5

    w2 = jax.random.normal(ks[6], (3, 3, Cout, Cout), jnp.float32) * 0.1  # HWIO
    b2 = 0.1 * jax.random.normal(ks[7], (Cout,), jnp.float32)
    g2 = 1.0 + 0.1 * jax.random.normal(ks[8], (Cout,), jnp.float32)
    be2 = 0.1 * jax.random.normal(ks[9], (Cout,), jnp.float32)
    m2 = 0.1 * jax.random.normal(ks[10], (Cout,), jnp.float32)
    v2 = jnp.abs(jax.random.normal(ks[11], (Cout,), jnp.float32)) + 0.5

    s1 = g1 / jnp.sqrt(v1 + eps)
    b1f = be1 - m1 * s1 + b1 * s1       # conv1 bias folded into BN1
    s2 = g2 / jnp.sqrt(v2 + eps)
    sh2 = be2 - m2 * s2                 # BN2 shift (conv2 bias folded in wrapper)

    # ECA layer: Conv1d(1, 1, k, padding=(k-1)//2, bias=False); k from in_channels*4.
    k = _eca_kernel_size(4 * Cin)
    pad = (k - 1) // 2
    w_eca = np.asarray(jax.random.normal(ks[12], (k,), jnp.float32)) * 0.5
    M = np.zeros((Cout, Cout), np.float32)
    for c in range(Cout):
        for t in range(k):
            jj = c + t - pad
            if 0 <= jj < Cout:
                M[c, jj] = w_eca[t]

    return dict(
        w1=w1, b1=b1, g1=g1, be1=be1, m1=m1, v1=v1,
        w2=w2, cb2=b2, g2=g2, be2=be2, m2=m2, v2=v2,
        s1=s1, b1f=b1f, s2=s2, sh2=sh2,
        ecaM=jnp.asarray(M),        # y = M @ sq (banded channel conv)
        a=0.5,                      # deterministic stand-in for torch.rand(1)
        e=0.7478,
    )


# --------------------------------------------------------------------------
# Pure-JAX reference (for numerical sanity check)
# --------------------------------------------------------------------------
def ref_forward(x, p, IPCPA):
    eps = 1e-5

    def conv(inp, w_hwio, bias):
        w = jnp.transpose(w_hwio, (3, 2, 0, 1))  # OIHW
        y = lax.conv_general_dilated(inp, w, (1, 1), ((1, 1), (1, 1)),
                                     dimension_numbers=('NCHW', 'OIHW', 'NCHW'))
        return y + bias[None, :, None, None]

    def bn(y, g, b, m, v):
        return ((y - m[None, :, None, None])
                / jnp.sqrt(v + eps)[None, :, None, None]
                * g[None, :, None, None] + b[None, :, None, None])

    c1 = conv(x, p['w1'], p['b1'])
    r1 = jnp.maximum(bn(c1, p['g1'], p['be1'], p['m1'], p['v1']), 0.0)
    c2 = conv(r1, p['w2'], p['cb2'])
    out1 = bn(c2, p['g2'], p['be2'], p['m2'], p['v2'])

    if IPCPA == 'True':
        N, C, H, W = c2.shape
        j = _crop_j(H, W)
        region = c2[..., j:W - j, j:H - j]
        if p['a'] > p['e']:
            sq = jnp.mean(region, axis=(-2, -1))
        else:
            sq = jnp.max(region, axis=(-2, -1))
        y = sq @ p['ecaM'].T
        sig = jax.nn.sigmoid(y)
        out = out1 * sig[:, :, None, None]
    else:
        out = c2
    return jnp.maximum(out, 0.0)


# --------------------------------------------------------------------------
if __name__ == "__main__":
    key = jax.random.PRNGKey(0)
    k_x, k_p, k_x2 = jax.random.split(key, 3)

    N, Cin, Cout = 2, 4, 8
    params = init_params(k_p, Cin, Cout)

    # Case 1: H*W a multiple of 128 (no lane padding); test the grid-parallel
    # path (auto batch_block -> 1, grid=2) and the lane-packed path (nb=2).
    x = jax.random.normal(k_x, (N, Cin, 16, 16), jnp.float32)
    for flag in ('False', 'True'):
        ref = jax.block_until_ready(ref_forward(x, params, flag))
        for nb in (None, 2):
            out = jax.block_until_ready(
                double_conv_forward(x, params, IPCPA=flag, batch_block=nb))
            np.testing.assert_allclose(np.asarray(out), np.asarray(ref),
                                       rtol=5e-2, atol=5e-2)

    # Case 2: H*W = 144 (not a multiple of 128) exercises the lane-pad path.
    x2 = jax.random.normal(k_x2, (N, Cin, 12, 12), jnp.float32)
    for flag in ('False', 'True'):
        ref2 = jax.block_until_ready(ref_forward(x2, params, flag))
        out2 = jax.block_until_ready(
            double_conv_forward(x2, params, IPCPA=flag))
        np.testing.assert_allclose(np.asarray(out2), np.asarray(ref2),
                                   rtol=5e-2, atol=5e-2)

    print("KERNEL_OK")
</pallas_src>

<mosaic_0001>
module attributes {stable_mosaic.version = 11 : i64} {
  func.func @_dc_kernel(%arg0: i32, %arg1: memref<1x4x256xf32, #tpu.memory_space<vmem>>, %arg2: memref<8x36xbf16, #tpu.memory_space<vmem>>, %arg3: memref<8x72xbf16, #tpu.memory_space<vmem>>, %arg4: memref<8x1xf32, #tpu.memory_space<vmem>>, %arg5: memref<8x1xf32, #tpu.memory_space<vmem>>, %arg6: memref<8x1xf32, #tpu.memory_space<vmem>>, %arg7: memref<8x1xf32, #tpu.memory_space<vmem>>, %arg8: memref<8x8xf32, #tpu.memory_space<vmem>>, %arg9: memref<9x8x256xf32, #tpu.memory_space<vmem>>, %arg10: memref<1x256xf32, #tpu.memory_space<vmem>>, %arg11: memref<1x8x256xf32, #tpu.memory_space<vmem>>, %arg12: memref<72x256xbf16, #tpu.memory_space<vmem>>) attributes {dimension_semantics = [#tpu.dimension_semantics<parallel>], iteration_bounds = array<i64: 2>, scalar_prefetch = 0 : i64, scratch_operands = 1 : i64, tpu.core_type = #tpu.core_type<tc>, window_params = [{transform_indices = @transform_0, window_bounds = array<i64: 1, 4, 256>}, {pipeline_mode = #tpu.pipeline_mode<synchronous>, transform_indices = @transform_1, window_bounds = array<i64: 8, 36>}, {pipeline_mode = #tpu.pipeline_mode<synchronous>, transform_indices = @transform_2, window_bounds = array<i64: 8, 72>}, {pipeline_mode = #tpu.pipeline_mode<synchronous>, transform_indices = @transform_3, window_bounds = array<i64: 8, 1>}, {pipeline_mode = #tpu.pipeline_mode<synchronous>, transform_indices = @transform_4, window_bounds = array<i64: 8, 1>}, {pipeline_mode = #tpu.pipeline_mode<synchronous>, transform_indices = @transform_5, window_bounds = array<i64: 8, 1>}, {pipeline_mode = #tpu.pipeline_mode<synchronous>, transform_indices = @transform_6, window_bounds = array<i64: 8, 1>}, {pipeline_mode = #tpu.pipeline_mode<synchronous>, transform_indices = @transform_7, window_bounds = array<i64: 8, 8>}, {pipeline_mode = #tpu.pipeline_mode<synchronous>, transform_indices = @transform_8, window_bounds = array<i64: 9, 8, 256>}, {pipeline_mode = #tpu.pipeline_mode<synchronous>, transform_indices = @transform_9, window_bounds = array<i64: 1, 256>}, {transform_indices = @transform_10, window_bounds = array<i64: 1, 8, 256>}]} {
    %c0 = arith.constant 0 : index
    %c0_0 = arith.constant 0 : index
    %0 = vector.load %arg2[%c0, %c0_0] : memref<8x36xbf16, #tpu.memory_space<vmem>>, vector<8x36xbf16>
    %c0_1 = arith.constant 0 : index
    %c0_2 = arith.constant 0 : index
    %1 = vector.load %arg3[%c0_1, %c0_2] : memref<8x72xbf16, #tpu.memory_space<vmem>>, vector<8x72xbf16>
    %c0_3 = arith.constant 0 : index
    %c0_4 = arith.constant 0 : index
    %2 = vector.load %arg4[%c0_3, %c0_4] : memref<8x1xf32, #tpu.memory_space<vmem>>, vector<8x1xf32>
    %c0_5 = arith.constant 0 : index
    %c0_6 = arith.constant 0 : index
    %3 = vector.load %arg7[%c0_5, %c0_6] : memref<8x1xf32, #tpu.memory_space<vmem>>, vector<8x1xf32>
    %c0_7 = arith.constant 0 : index
    %c0_8 = arith.constant 0 : index
    %c0_9 = arith.constant 0 : index
    %4 = vector.load %arg1[%c0_7, %c0_8, %c0_9] : memref<1x4x256xf32, #tpu.memory_space<vmem>>, vector<1x4x256xf32>
    %5 = vector.shape_cast %4 : vector<1x4x256xf32> to vector<4x256xf32>
    %c17_i32 = arith.constant 17 : i32
    %6 = tpu.dynamic_rotate %5 by %c17_i32 dim 1 : vector<4x256xf32>, i32 -> vector<4x256xf32>
    %c0_10 = arith.constant 0 : index
    %c0_11 = arith.constant 0 : index
    %c0_12 = arith.constant 0 : index
    %7 = vector.load %arg9[%c0_10, %c0_11, %c0_12] : memref<9x8x256xf32, #tpu.memory_space<vmem>>, vector<1x8x256xf32>
    %8 = vector.shape_cast %7 : vector<1x8x256xf32> to vector<8x256xf32>
    %9 = vector.extract_strided_slice %8 {offsets = [0, 0], sizes = [4, 256], strides = [1, 1]} : vector<8x256xf32> to vector<4x256xf32>
    %10 = arith.mulf %6, %9 : vector<4x256xf32>
    %11 = arith.truncf %10 : vector<4x256xf32> to vector<4x256xbf16>
    %c0_13 = arith.constant 0 : index
    %c0_14 = arith.constant 0 : index
    %12 = vector.load %arg12[%c0_13, %c0_14] : memref<72x256xbf16, #tpu.memory_space<vmem>>, vector<4x256xbf16>
    tpu.vector_store %arg12[%c0_13, %c0_14], %11 {strides = array<i32>} : memref<72x256xbf16, #tpu.memory_space<vmem>>, vector<4x256xbf16>,
    %c16_i32 = arith.constant 16 : i32
    %13 = tpu.dynamic_rotate %5 by %c16_i32 dim 1 : vector<4x256xf32>, i32 -> vector<4x256xf32>
    %c1 = arith.constant 1 : index
    %c0_15 = arith.constant 0 : index
    %c0_16 = arith.constant 0 : index
    %14 = vector.load %arg9[%c1, %c0_15, %c0_16] : memref<9x8x256xf32, #tpu.memory_space<vmem>>, vector<1x8x256xf32>
    %15 = vector.shape_cast %14 : vector<1x8x256xf32> to vector<8x256xf32>
    %16 = vector.extract_strided_slice %15 {offsets = [0, 0], sizes = [4, 256], strides = [1, 1]} : vector<8x256xf32> to vector<4x256xf32>
    %17 = arith.mulf %13, %16 : vector<4x256xf32>
    %18 = arith.truncf %17 : vector<4x256xf32> to vector<4x256xbf16>
    %c4 = arith.constant 4 : index
    %c0_17 = arith.constant 0 : index
    %19 = vector.load %arg12[%c4, %c0_17] : memref<72x256xbf16, #tpu.memory_space<vmem>>, vector<4x256xbf16>
    tpu.vector_store %arg12[%c4, %c0_17], %18 {strides = array<i32>} : memref<72x256xbf16, #tpu.memory_space<vmem>>, vector<4x256xbf16>,
    %c15_i32 = arith.constant 15 : i32
    %20 = tpu.dynamic_rotate %5 by %c15_i32 dim 1 : vector<4x256xf32>, i32 -> vector<4x256xf32>
    %c2 = arith.constant 2 : index
    %c0_18 = arith.constant 0 : index
    %c0_19 = arith.constant 0 : index
    %21 = vector.load %arg9[%c2, %c0_18, %c0_19] : memref<9x8x256xf32, #tpu.memory_space<vmem>>, vector<1x8x256xf32>
    %22 = vector.shape_cast %21 : vector<1x8x256xf32> to vector<8x256xf32>
    %23 = vector.extract_strided_slice %22 {offsets = [0, 0], sizes = [4, 256], strides = [1, 1]} : vector<8x256xf32> to vector<4x256xf32>
    %24 = arith.mulf %20, %23 : vector<4x256xf32>
    %25 = arith.truncf %24 : vector<4x256xf32> to vector<4x256xbf16>
    %c8 = arith.constant 8 : index
    %c0_20 = arith.constant 0 : index
    %26 = vector.load %arg12[%c8, %c0_20] : memref<72x256xbf16, #tpu.memory_space<vmem>>, vector<4x256xbf16>
    tpu.vector_store %arg12[%c8, %c0_20], %25 {strides = array<i32>} : memref<72x256xbf16, #tpu.memory_space<vmem>>, vector<4x256xbf16>,
    %c1_i32 = arith.constant 1 : i32
    %27 = tpu.dynamic_rotate %5 by %c1_i32 dim 1 : vector<4x256xf32>, i32 -> vector<4x256xf32>
    %c3 = arith.constant 3 : index
    %c0_21 = arith.constant 0 : index
    %c0_22 = arith.constant 0 : index
    %28 = vector.load %arg9[%c3, %c0_21, %c0_22] : memref<9x8x256xf32, #tpu.memory_space<vmem>>, vector<1x8x256xf32>
    %29 = vector.shape_cast %28 : vector<1x8x256xf32> to vector<8x256xf32>
    %30 = vector.extract_strided_slice %29 {offsets = [0, 0], sizes = [4, 256], strides = [1, 1]} : vector<8x256xf32> to vector<4x256xf32>
    %31 = arith.mulf %27, %30 : vector<4x256xf32>
    %32 = arith.truncf %31 : vector<4x256xf32> to vector<4x256xbf16>
    %c12 = arith.constant 12 : index
    %c0_23 = arith.constant 0 : index
    %33 = vector.load %arg12[%c12, %c0_23] : memref<72x256xbf16, #tpu.memory_space<vmem>>, vector<4x256xbf16>
    tpu.vector_store %arg12[%c12, %c0_23], %32 {strides = array<i32>} : memref<72x256xbf16, #tpu.memory_space<vmem>>, vector<4x256xbf16>,
    %34 = arith.truncf %5 : vector<4x256xf32> to vector<4x256xbf16>
    %c16 = arith.constant 16 : index
    %c0_24 = arith.constant 0 : index
    %35 = vector.load %arg12[%c16, %c0_24] : memref<72x256xbf16, #tpu.memory_space<vmem>>, vector<4x256xbf16>
    tpu.vector_store %arg12[%c16, %c0_24], %34 {strides = array<i32>} : memref<72x256xbf16, #tpu.memory_space<vmem>>, vector<4x256xbf16>,
    %c255_i32 = arith.constant 255 : i32
    %36 = tpu.dynamic_rotate %5 by %c255_i32 dim 1 : vector<4x256xf32>, i32 -> vector<4x256xf32>
    %c5 = arith.constant 5 : index
    %c0_25 = arith.constant 0 : index
    %c0_26 = arith.constant 0 : index
    %37 = vector.load %arg9[%c5, %c0_25, %c0_26] : memref<9x8x256xf32, #tpu.memory_space<vmem>>, vector<1x8x256xf32>
    %38 = vector.shape_cast %37 : vector<1x8x256xf32> to vector<8x256xf32>
    %39 = vector.extract_strided_slice %38 {offsets = [0, 0], sizes = [4, 256], strides = [1, 1]} : vector<8x256xf32> to vector<4x256xf32>
    %40 = arith.mulf %36, %39 : vector<4x256xf32>
    %41 = arith.truncf %40 : vector<4x256xf32> to vector<4x256xbf16>
    %c20 = arith.constant 20 : index
    %c0_27 = arith.constant 0 : index
    %42 = vector.load %arg12[%c20, %c0_27] : memref<72x256xbf16, #tpu.memory_space<vmem>>, vector<4x256xbf16>
    tpu.vector_store %arg12[%c20, %c0_27], %41 {strides = array<i32>} : memref<72x256xbf16, #tpu.memory_space<vmem>>, vector<4x256xbf16>,
    %c241_i32 = arith.constant 241 : i32
    %43 = tpu.dynamic_rotate %5 by %c241_i32 dim 1 : vector<4x256xf32>, i32 -> vector<4x256xf32>
    %c6 = arith.constant 6 : index
    %c0_28 = arith.constant 0 : index
    %c0_29 = arith.constant 0 : index
    %44 = vector.load %arg9[%c6, %c0_28, %c0_29] : memref<9x8x256xf32, #tpu.memory_space<vmem>>, vector<1x8x256xf32>
    %45 = vector.shape_cast %44 : vector<1x8x256xf32> to vector<8x256xf32>
    %46 = vector.extract_strided_slice %45 {offsets = [0, 0], sizes = [4, 256], strides = [1, 1]} : vector<8x256xf32> to vector<4x256xf32>
    %47 = arith.mulf %43, %46 : vector<4x256xf32>
    %48 = arith.truncf %47 : vector<4x256xf32> to vector<4x256xbf16>
    %c24 = arith.constant 24 : index
    %c0_30 = arith.constant 0 : index
    %49 = vector.load %arg12[%c24, %c0_30] : memref<72x256xbf16, #tpu.memory_space<vmem>>, vector<4x256xbf16>
    tpu.vector_store %arg12[%c24, %c0_30], %48 {strides = array<i32>} : memref<72x256xbf16, #tpu.memory_space<vmem>>, vector<4x256xbf16>,
    %c240_i32 = arith.constant 240 : i32
    %50 = tpu.dynamic_rotate %5 by %c240_i32 dim 1 : vector<4x256xf32>, i32 -> vector<4x256xf32>
    %c7 = arith.constant 7 : index
    %c0_31 = arith.constant 0 : index
    %c0_32 = arith.constant 0 : index
    %51 = vector.load %arg9[%c7, %c0_31, %c0_32] : memref<9x8x256xf32, #tpu.memory_space<vmem>>, vector<1x8x256xf32>
    %52 = vector.shape_cast %51 : vector<1x8x256xf32> to vector<8x256xf32>
    %53 = vector.extract_strided_slice %52 {offsets = [0, 0], sizes = [4, 256], strides = [1, 1]} : vector<8x256xf32> to vector<4x256xf32>
    %54 = arith.mulf %50, %53 : vector<4x256xf32>
    %55 = arith.truncf %54 : vector<4x256xf32> to vector<4x256xbf16>
    %c28 = arith.constant 28 : index
    %c0_33 = arith.constant 0 : index
    %56 = vector.load %arg12[%c28, %c0_33] : memref<72x256xbf16, #tpu.memory_space<vmem>>, vector<4x256xbf16>
    tpu.vector_store %arg12[%c28, %c0_33], %55 {strides = array<i32>} : memref<72x256xbf16, #tpu.memory_space<vmem>>, vector<4x256xbf16>,
    %c239_i32 = arith.constant 239 : i32
    %57 = tpu.dynamic_rotate %5 by %c239_i32 dim 1 : vector<4x256xf32>, i32 -> vector<4x256xf32>
    %c8_34 = arith.constant 8 : index
    %c0_35 = arith.constant 0 : index
    %c0_36 = arith.constant 0 : index
    %58 = vector.load %arg9[%c8_34, %c0_35, %c0_36] : memref<9x8x256xf32, #tpu.memory_space<vmem>>, vector<1x8x256xf32>
    %59 = vector.shape_cast %58 : vector<1x8x256xf32> to vector<8x256xf32>
    %60 = vector.extract_strided_slice %59 {offsets = [0, 0], sizes = [4, 256], strides = [1, 1]} : vector<8x256xf32> to vector<4x256xf32>
    %61 = arith.mulf %57, %60 : vector<4x256xf32>
    %62 = arith.truncf %61 : vector<4x256xf32> to vector<4x256xbf16>
    %c32 = arith.constant 32 : index
    %c0_37 = arith.constant 0 : index
    %63 = vector.load %arg12[%c32, %c0_37] : memref<72x256xbf16, #tpu.memory_space<vmem>>, vector<4x256xbf16>
    tpu.vector_store %arg12[%c32, %c0_37], %62 {strides = array<i32>} : memref<72x256xbf16, #tpu.memory_space<vmem>>, vector<4x256xbf16>,
    %c0_38 = arith.constant 0 : index
    %c0_39 = arith.constant 0 : index
    %64 = vector.load %arg12[%c0_38, %c0_39] : memref<72x256xbf16, #tpu.memory_space<vmem>>, vector<36x256xbf16>
    %cst = arith.constant dense<0.000000e+00> : vector<8x256xf32>
    %65 = tpu.matmul %0, %64, %cst {dimension_numbers = #tpu.dot_dimension_numbers<[1], [0], [0], [1], [0, 0, 1, 1], [], []>} : vector<8x36xbf16>, vector<36x256xbf16>, vector<8x256xf32> -> vector<8x256xf32>
    %66 = vector.broadcast %2 : vector<8x1xf32> to vector<8x256xf32>
    %67 = arith.addf %65, %66 : vector<8x256xf32>
    %cst_40 = arith.constant 0.000000e+00 : f32
    %68 = vector.broadcast %cst_40 : f32 to vector<8x256xf32>
    %69 = arith.maximumf %67, %68 : vector<8x256xf32>
    %c17_i32_41 = arith.constant 17 : i32
    %70 = tpu.dynamic_rotate %69 by %c17_i32_41 dim 1 : vector<8x256xf32>, i32 -> vector<8x256xf32>
    %c0_42 = arith.constant 0 : index
    %c0_43 = arith.constant 0 : index
    %c0_44 = arith.constant 0 : index
    %71 = vector.load %arg9[%c0_42, %c0_43, %c0_44] : memref<9x8x256xf32, #tpu.memory_space<vmem>>, vector<1x8x256xf32>
    %72 = vector.shape_cast %71 : vector<1x8x256xf32> to vector<8x256xf32>
    %73 = arith.mulf %70, %72 : vector<8x256xf32>
    %74 = arith.truncf %73 : vector<8x256xf32> to vector<8x256xbf16>
    %c0_45 = arith.constant 0 : index
    %c0_46 = arith.constant 0 : index
    %75 = vector.load %arg12[%c0_45, %c0_46] : memref<72x256xbf16, #tpu.memory_space<vmem>>, vector<8x256xbf16>
    tpu.vector_store %arg12[%c0_45, %c0_46], %74 {strides = array<i32>} : memref<72x256xbf16, #tpu.memory_space<vmem>>, vector<8x256xbf16>,
    %c16_i32_47 = arith.constant 16 : i32
    %76 = tpu.dynamic_rotate %69 by %c16_i32_47 dim 1 : vector<8x256xf32>, i32 -> vector<8x256xf32>
    %c1_48 = arith.constant 1 : index
    %c0_49 = arith.constant 0 : index
    %c0_50 = arith.constant 0 : index
    %77 = vector.load %arg9[%c1_48, %c0_49, %c0_50] : memref<9x8x256xf32, #tpu.memory_space<vmem>>, vector<1x8x256xf32>
    %78 = vector.shape_cast %77 : vector<1x8x256xf32> to vector<8x256xf32>
    %79 = arith.mulf %76, %78 : vector<8x256xf32>
    %80 = arith.truncf %79 : vector<8x256xf32> to vector<8x256xbf16>
    %c8_51 = arith.constant 8 : index
    %c0_52 = arith.constant 0 : index
    %81 = vector.load %arg12[%c8_51, %c0_52] : memref<72x256xbf16, #tpu.memory_space<vmem>>, vector<8x256xbf16>
    tpu.vector_store %arg12[%c8_51, %c0_52], %80 {strides = array<i32>} : memref<72x256xbf16, #tpu.memory_space<vmem>>, vector<8x256xbf16>,
    %c15_i32_53 = arith.constant 15 : i32
    %82 = tpu.dynamic_rotate %69 by %c15_i32_53 dim 1 : vector<8x256xf32>, i32 -> vector<8x256xf32>
    %c2_54 = arith.constant 2 : index
    %c0_55 = arith.constant 0 : index
    %c0_56 = arith.constant 0 : index
    %83 = vector.load %arg9[%c2_54, %c0_55, %c0_56] : memref<9x8x256xf32, #tpu.memory_space<vmem>>, vector<1x8x256xf32>
    %84 = vector.shape_cast %83 : vector<1x8x256xf32> to vector<8x256xf32>
    %85 = arith.mulf %82, %84 : vector<8x256xf32>
    %86 = arith.truncf %85 : vector<8x256xf32> to vector<8x256xbf16>
    %c16_57 = arith.constant 16 : index
    %c0_58 = arith.constant 0 : index
    %87 = vector.load %arg12[%c16_57, %c0_58] : memref<72x256xbf16, #tpu.memory_space<vmem>>, vector<8x256xbf16>
    tpu.vector_store %arg12[%c16_57, %c0_58], %86 {strides = array<i32>} : memref<72x256xbf16, #tpu.memory_space<vmem>>, vector<8x256xbf16>,
    %c1_i32_59 = arith.constant 1 : i32
    %88 = tpu.dynamic_rotate %69 by %c1_i32_59 dim 1 : vector<8x256xf32>, i32 -> vector<8x256xf32>
    %c3_60 = arith.constant 3 : index
    %c0_61 = arith.constant 0 : index
    %c0_62 = arith.constant 0 : index
    %89 = vector.load %arg9[%c3_60, %c0_61, %c0_62] : memref<9x8x256xf32, #tpu.memory_space<vmem>>, vector<1x8x256xf32>
    %90 = vector.shape_cast %89 : vector<1x8x256xf32> to vector<8x256xf32>
    %91 = arith.mulf %88, %90 : vector<8x256xf32>
    %92 = arith.truncf %91 : vector<8x256xf32> to vector<8x256xbf16>
    %c24_63 = arith.constant 24 : index
    %c0_64 = arith.constant 0 : index
    %93 = vector.load %arg12[%c24_63, %c0_64] : memref<72x256xbf16, #tpu.memory_space<vmem>>, vector<8x256xbf16>
    tpu.vector_store %arg12[%c24_63, %c0_64], %92 {strides = array<i32>} : memref<72x256xbf16, #tpu.memory_space<vmem>>, vector<8x256xbf16>,
    %94 = arith.truncf %69 : vector<8x256xf32> to vector<8x256xbf16>
    %c32_65 = arith.constant 32 : index
    %c0_66 = arith.constant 0 : index
    %95 = vector.load %arg12[%c32_65, %c0_66] : memref<72x256xbf16, #tpu.memory_space<vmem>>, vector<8x256xbf16>
    tpu.vector_store %arg12[%c32_65, %c0_66], %94 {strides = array<i32>} : memref<72x256xbf16, #tpu.memory_space<vmem>>, vector<8x256xbf16>,
    %c255_i32_67 = arith.constant 255 : i32
    %96 = tpu.dynamic_rotate %69 by %c255_i32_67 dim 1 : vector<8x256xf32>, i32 -> vector<8x256xf32>
    %c5_68 = arith.constant 5 : index
    %c0_69 = arith.constant 0 : index
    %c0_70 = arith.constant 0 : index
    %97 = vector.load %arg9[%c5_68, %c0_69, %c0_70] : memref<9x8x256xf32, #tpu.memory_space<vmem>>, vector<1x8x256xf32>
    %98 = vector.shape_cast %97 : vector<1x8x256xf32> to vector<8x256xf32>
    %99 = arith.mulf %96, %98 : vector<8x256xf32>
    %100 = arith.truncf %99 : vector<8x256xf32> to vector<8x256xbf16>
    %c40 = arith.constant 40 : index
    %c0_71 = arith.constant 0 : index
    %101 = vector.load %arg12[%c40, %c0_71] : memref<72x256xbf16, #tpu.memory_space<vmem>>, vector<8x256xbf16>
    tpu.vector_store %arg12[%c40, %c0_71], %100 {strides = array<i32>} : memref<72x256xbf16, #tpu.memory_space<vmem>>, vector<8x256xbf16>,
    %c241_i32_72 = arith.constant 241 : i32
    %102 = tpu.dynamic_rotate %69 by %c241_i32_72 dim 1 : vector<8x256xf32>, i32 -> vector<8x256xf32>
    %c6_73 = arith.constant 6 : index
    %c0_74 = arith.constant 0 : index
    %c0_75 = arith.constant 0 : index
    %103 = vector.load %arg9[%c6_73, %c0_74, %c0_75] : memref<9x8x256xf32, #tpu.memory_space<vmem>>, vector<1x8x256xf32>
    %104 = vector.shape_cast %103 : vector<1x8x256xf32> to vector<8x256xf32>
    %105 = arith.mulf %102, %104 : vector<8x256xf32>
    %106 = arith.truncf %105 : vector<8x256xf32> to vector<8x256xbf16>
    %c48 = arith.constant 48 : index
    %c0_76 = arith.constant 0 : index
    %107 = vector.load %arg12[%c48, %c0_76] : memref<72x256xbf16, #tpu.memory_space<vmem>>, vector<8x256xbf16>
    tpu.vector_store %arg12[%c48, %c0_76], %106 {strides = array<i32>} : memref<72x256xbf16, #tpu.memory_space<vmem>>, vector<8x256xbf16>,
    %c240_i32_77 = arith.constant 240 : i32
    %108 = tpu.dynamic_rotate %69 by %c240_i32_77 dim 1 : vector<8x256xf32>, i32 -> vector<8x256xf32>
    %c7_78 = arith.constant 7 : index
    %c0_79 = arith.constant 0 : index
    %c0_80 = arith.constant 0 : index
    %109 = vector.load %arg9[%c7_78, %c0_79, %c0_80] : memref<9x8x256xf32, #tpu.memory_space<vmem>>, vector<1x8x256xf32>
    %110 = vector.shape_cast %109 : vector<1x8x256xf32> to vector<8x256xf32>
    %111 = arith.mulf %108, %110 : vector<8x256xf32>
    %112 = arith.truncf %111 : vector<8x256xf32> to vector<8x256xbf16>
    %c56 = arith.constant 56 : index
    %c0_81 = arith.constant 0 : index
    %113 = vector.load %arg12[%c56, %c0_81] : memref<72x256xbf16, #tpu.memory_space<vmem>>, vector<8x256xbf16>
    tpu.vector_store %arg12[%c56, %c0_81], %112 {strides = array<i32>} : memref<72x256xbf16, #tpu.memory_space<vmem>>, vector<8x256xbf16>,
    %c239_i32_82 = arith.constant 239 : i32
    %114 = tpu.dynamic_rotate %69 by %c239_i32_82 dim 1 : vector<8x256xf32>, i32 -> vector<8x256xf32>
    %c8_83 = arith.constant 8 : index
    %c0_84 = arith.constant 0 : index
    %c0_85 = arith.constant 0 : index
    %115 = vector.load %arg9[%c8_83, %c0_84, %c0_85] : memref<9x8x256xf32, #tpu.memory_space<vmem>>, vector<1x8x256xf32>
    %116 = vector.shape_cast %115 : vector<1x8x256xf32> to vector<8x256xf32>
    %117 = arith.mulf %114, %116 : vector<8x256xf32>
    %118 = arith.truncf %117 : vector<8x256xf32> to vector<8x256xbf16>
    %c64 = arith.constant 64 : index
    %c0_86 = arith.constant 0 : index
    %119 = vector.load %arg12[%c64, %c0_86] : memref<72x256xbf16, #tpu.memory_space<vmem>>, vector<8x256xbf16>
    tpu.vector_store %arg12[%c64, %c0_86], %118 {strides = array<i32>} : memref<72x256xbf16, #tpu.memory_space<vmem>>, vector<8x256xbf16>,
    %c0_87 = arith.constant 0 : index
    %c0_88 = arith.constant 0 : index
    %120 = vector.load %arg12[%c0_87, %c0_88] : memref<72x256xbf16, #tpu.memory_space<vmem>>, vector<72x256xbf16>
    %cst_89 = arith.constant dense<0.000000e+00> : vector<8x256xf32>
    %121 = tpu.matmul %1, %120, %cst_89 {dimension_numbers = #tpu.dot_dimension_numbers<[1], [0], [0], [1], [0, 0, 1, 1], [], []>} : vector<8x72xbf16>, vector<72x256xbf16>, vector<8x256xf32> -> vector<8x256xf32>
    %122 = vector.broadcast %3 : vector<8x1xf32> to vector<8x256xf32>
    %123 = arith.addf %121, %122 : vector<8x256xf32>
    %cst_90 = arith.constant 0.000000e+00 : f32
    %124 = vector.broadcast %cst_90 : f32 to vector<8x256xf32>
    %125 = arith.maximumf %123, %124 : vector<8x256xf32>
    %c0_91 = arith.constant 0 : index
    %c0_92 = arith.constant 0 : index
    %c0_93 = arith.constant 0 : index
    %126 = vector.load %arg11[%c0_91, %c0_92, %c0_93] : memref<1x8x256xf32, #tpu.memory_space<vmem>>, vector<1x8x256xf32>
    %127 = vector.shape_cast %126 : vector<1x8x256xf32> to vector<8x256xf32>
    %128 = vector.shape_cast %125 : vector<8x256xf32> to vector<1x8x256xf32>
    tpu.vector_store %arg11[%c0_91, %c0_92, %c0_93], %128 {strides = array<i32>} : memref<1x8x256xf32, #tpu.memory_space<vmem>>, vector<1x8x256xf32>,
    return
  }
  func.func @transform_0(%arg0: i32) -> (i32, i32, i32) {
    %c0_i32 = arith.constant 0 : i32
    %c0_i32_0 = arith.constant 0 : i32
    %c0_i32_1 = arith.constant 0 : i32
    return %arg0, %c0_i32, %c0_i32_0 : i32, i32, i32
  }
  func.func @transform_1(%arg0: i32) -> (i32, i32) {
    %c0_i32 = arith.constant 0 : i32
    %c0_i32_0 = arith.constant 0 : i32
    %c0_i32_1 = arith.constant 0 : i32
    return %c0_i32, %c0_i32_0 : i32, i32
  }
  func.func @transform_2(%arg0: i32) -> (i32, i32) {
    %c0_i32 = arith.constant 0 : i32
    %c0_i32_0 = arith.constant 0 : i32
    %c0_i32_1 = arith.constant 0 : i32
    return %c0_i32, %c0_i32_0 : i32, i32
  }
  func.func @transform_3(%arg0: i32) -> (i32, i32) {
    %c0_i32 = arith.constant 0 : i32
    %c0_i32_0 = arith.constant 0 : i32
    %c0_i32_1 = arith.constant 0 : i32
    return %c0_i32, %c0_i32_0 : i32, i32
  }
  func.func @transform_4(%arg0: i32) -> (i32, i32) {
    %c0_i32 = arith.constant 0 : i32
    %c0_i32_0 = arith.constant 0 : i32
    %c0_i32_1 = arith.constant 0 : i32
    return %c0_i32, %c0_i32_0 : i32, i32
  }
  func.func @transform_5(%arg0: i32) -> (i32, i32) {
    %c0_i32 = arith.constant 0 : i32
    %c0_i32_0 = arith.constant 0 : i32
    %c0_i32_1 = arith.constant 0 : i32
    return %c0_i32, %c0_i32_0 : i32, i32
  }
  func.func @transform_6(%arg0: i32) -> (i32, i32) {
    %c0_i32 = arith.constant 0 : i32
    %c0_i32_0 = arith.constant 0 : i32
    %c0_i32_1 = arith.constant 0 : i32
    return %c0_i32, %c0_i32_0 : i32, i32
  }
  func.func @transform_7(%arg0: i32) -> (i32, i32) {
    %c0_i32 = arith.constant 0 : i32
    %c0_i32_0 = arith.constant 0 : i32
    %c0_i32_1 = arith.constant 0 : i32
    return %c0_i32, %c0_i32_0 : i32, i32
  }
  func.func @transform_8(%arg0: i32) -> (i32, i32, i32) {
    %c0_i32 = arith.constant 0 : i32
    %c0_i32_0 = arith.constant 0 : i32
    %c0_i32_1 = arith.constant 0 : i32
    %c0_i32_2 = arith.constant 0 : i32
    return %c0_i32, %c0_i32_0, %c0_i32_1 : i32, i32, i32
  }
  func.func @transform_9(%arg0: i32) -> (i32, i32) {
    %c0_i32 = arith.constant 0 : i32
    %c0_i32_0 = arith.constant 0 : i32
    %c0_i32_1 = arith.constant 0 : i32
    return %c0_i32, %c0_i32_0 : i32, i32
  }
  func.func @transform_10(%arg0: i32) -> (i32, i32, i32) {
    %c0_i32 = arith.constant 0 : i32
    %c0_i32_0 = arith.constant 0 : i32
    %c0_i32_1 = arith.constant 0 : i32
    return %arg0, %c0_i32, %c0_i32_0 : i32, i32, i32
  }
}

</mosaic_0001>

<bundles_post_ra>
// kernel: tpu_custom_call.1
= control target key start
LH: loop header
LB: loop body
LE: loop exit
PB: predicated region body
PF: predicated region fallthrough
CT: control target
= control target key end

     0   :  { %15 = vsyncpa [#allocation4], 0  ;;  %s1673_s0 = inlined_call_operand.vmem [shape: f32[2,4,256], index: 0, kind: input, shape index: {}]   ;;  %s1674_s1 = inlined_call_operand.vmem [shape: bf16[8,36], index: 1, kind: input, shape index: {}]   ;;  %s1675_s2 = inlined_call_operand.vmem [shape: bf16[8,72], index: 2, kind: input, shape index: {}]   ;;  %s1676_s3 = inlined_call_operand.vmem [shape: f32[8,1], index: 3, kind: input, shape index: {}]   ;;  %s1677_s4 = inlined_call_operand.vmem [shape: f32[8,1], index: 4, kind: input, shape index: {}]   ;;  %s1678_s5 = inlined_call_operand.vmem [shape: f32[8,1], index: 5, kind: input, shape index: {}]   ;;  %s1679_s6 = inlined_call_operand.vmem [shape: f32[8,1], index: 6, kind: input, shape index: {}]   ;;  %s1680_s7 = inlined_call_operand.vmem [shape: f32[8,8], index: 7, kind: input, shape index: {}]   ;;  %s1681_s8 = inlined_call_operand.hbm [shape: f32[9,8,256], index: 8, kind: input, shape index: {}]   ;;  %s1682_s9 = inlined_call_operand.vmem [shape: f32[1,256], index: 9, kind: input, shape index: {}]   ;;  %s1683_s10 = inlined_call_operand.hbm [shape: f32[2,8,256], index: 10, kind: output, shape index: {}]  }
   0x1   :  { %16 = vsyncpa [#allocation5], 0 }
   0x2   :  { %18 = vsyncpa [#allocation5 + $0x1], 0  ;;  %s1332_s4 = smov 0   ;;  %s1334_s5 = smov 0  }
   0x3   :  { %s1336_s13 = smov 0   ;;  %s1338_s14 = smov 0  }
   0x4 LB: > { %s1353_s7 = sadd.s32 4294967295, %s1262_s14   ;;  %s1015_s9 = sadd.s32 4294967294, %s1262_s14   ;;  %s1262_s14 = sphi %s1338_s14, %s1699_s14   ;;  %s1258_s13 = sphi %s1336_s13, %s1698_s13   ;;  %s1254_s5 = sphi %s1334_s5, %s1697_s5   ;;  %s1250_s4 = sphi %s1332_s4, %s1696_s4  }
   0x5   : > { %s1357_s15 = sadd.s32 1, %s1262_s14   ;;  %s246_s16 = sadd.s32 1, %s1258_s13 }
   0x6   : > { %s243_s17 = ssub.s32 %s1262_s14, %s1357_s15  ;;  %p256_p0 = scmp.ne.s32.totalorder %s1258_s13, %s1254_s5 }
   0x7   : > { %p244_p1 = scmp.eq.s32.totalorder %s243_s17, 0  ;;  %p257_p2 = scmp.eq.s32.totalorder %s1353_s7, 1 }
   0x8   : > { %p262_p3 = scmp.ne.s32.totalorder %s1254_s5, %s1250_s4  ;;  %p263_p4 = scmp.eq.s32.totalorder %s1015_s9, 1 }
   0x9   : > { %s1368_s18 = scalar_select %p244_p1, %s1258_s13, %s246_s16  }
   0xa   : > { %p1370_p5 = por %p257_p2, %p256_p0  ;;  %p1374_p6 = por %p263_p4, %p262_p3 }
   0xb   : > { %p1016_p7 = scmp.ge.s32.totalorder %s1262_s14, 1  ;;  %p270_p8 = scmp.lt.s32.totalorder %s1262_s14, 3 }
   0xc   : > { %s1687_s19 = scalar_select %p1370_p5, 1, 0 }
   0xd   : > { %s1688_s20 = scalar_select %p1374_p6, 1, 0 }
   0xe   : > { %p1684_p9 = scmp.eq.s32.totalorder %s1353_s7, 0  ;;  %p1381_p10 = pnand %p1016_p7, %p270_p8 }
   0xf   : > { %s1264_s22 = smov [#allocation3]   ;;  %s1168_s27 = scalar_lea.hbm %s1681_s8, 2304 }
  0x10   : > { %s1689_s21 = scalar_select %p1381_p10, 1, 0 }
  0x11   : > { %s303_s23 = sshll.u32 %s1264_s22, 4  ;;  %p1093_p11 = pneg %p1381_p10  ;;  %s304_s23 = int_to_ptr.vmem [resolvable:$true] %s303_s23 }
  0x12   : > { %p1169_p13 = scmp.ne.s32.totalorder %s1681_s8, %s1168_s27  ;;  %p1175_p3 = scmp.lt.u32.totalorder %s1168_s27, %s1681_s8 }
  0x13   : > { %p1389_p12 = pnand %p1684_p9, %p1093_p11 }
  0x15   : > { %p1170_p0 = pneg %p1389_p12 }
  0x17   : > { %p1171_p1 = pnand %p1170_p0, %p1169_p13 }
  0x19   : > { %p1172_p2 = pneg %p1171_p1 }
  0x1b   : > { %p1177_p4 = pnand %p1175_p3, %p1172_p2 }
  0x1d   : > { %1180 = shalt.err (!%p1177_p4)
}
  0x1e   : > { %s1181_s12 = scalar_lea.vmem %s304_s23, 2304  ;;  %p1189_p9 = scmp.lt.s32.totalorder %s304_s23, %s304_s23 }
  0x1f   : > { %p1182_p7 = scmp.ne.s32.totalorder %s304_s23, %s1181_s12  ;;  %p1190_p6 = scmp.lt.s32.totalorder %s1181_s12, %s1181_s12 }
  0x21   : > { %p1184_p8 = pnand %p1182_p7, %p1170_p0  ;;  %p1191_p5 = por %p1190_p6, %p1189_p9 }
  0x23   : > { %p1185_p11 = pneg %p1184_p8 }
  0x25   : > { %p1192_p10 = pnand %p1191_p5, %p1185_p11 }
  0x27   : > { %1195 = shalt.err (!%p1192_p10)
}
  0x28   : > { %s1265_s9 = smov 256   ;;  %s1266_s16 = smov 16  }
  0x29   : > { %1096 = dma.hbm_to_vmem [thread:$0]  (!%p1389_p12), %s1681_s8, 2304, %s304_s23, [#allocation4], %s1265_s9, %s1265_s9, %s1266_s16  }
  0x2a   : > { %p1691_p13 = scmp.ne.s32.totalorder %s1689_s21, 0 }
  0x2b   : > { %p1692_p1 = scmp.eq.s32.totalorder (!%p1691_p13), %s1353_s7, 0 }
  0x2c   : > { %330 = sbr.rel (%p1691_p13) target bundleno = 824 (0x338), region = 60 }
  0x33   : > { %1241 = dma.done.wait (%p1692_p1), [#allocation4], 2304   ;;  %p1693_p0 = pmov %p1692_p1 }
  0x34   : > { %p368_p5 = scmp.lt.s32.totalorder %s1353_s7, 1  ;;  %s1267_s23 = smov 1   ;;  %v1275_v3 = vmov 0   ;;  %v376_v4 = vld [vmem:[%s1676_s3] sm:$0xff]  ;;  %v386_v5 = vlaneseq  ;;  %v1442_v9 = vld [vmem:[#allocation3 + $0x30] sm:$0xff]  ;;  %v1454_v17 = vld [vmem:[#allocation3] sm:$0xff] }
  0x35   : > { %1243 = vsyncadd (%p1693_p0), [#allocation4], 4294964992  ;;  %s1268_s21 = smov 16   ;;  %s1269_s29 = smov 17   ;;  %642 = vmatprep.mubr.bf16.mxu0 %v1275_v3  ;;  %1148 = vset.pattern.permute.xlu0 %v1275_v3  ;;  %v1444_v10 = vld [vmem:[#allocation3 + $0x38] sm:$0xff]  ;;  %v1456_v18 = vld [vmem:[#allocation3 + $0x8] sm:$0xff] }
  0x36   : > { %s369_s25 = scalar_select %p368_p5, %s1353_s7, 1  ;;  %916 = vmatprep.mubr.bf16.mxu1 %v1275_v3  ;;  %v1439_v6 = vand.u32 127, %v386_v5  ;;  %v1458_v19 = vld [vmem:[#allocation3 + $0x10] sm:$0xff]  ;;  %v1460_v22 = vld [vmem:[#allocation3 + $0x18] sm:$0xff]  ;;  %v1475_v33 = vld [vmem:[#allocation3 + $0x20] sm:$0xff]  ;;  %vm603_vm8 = vcmask 1041408  }
  0x37   : > { %s1270_s30 = smov 15   ;;  %s1271_s11 = smov 127   ;;  %v1477_v34 = vld [vmem:[#allocation3 + $0x28] sm:$0xff]  ;;  %v1486_v44 = vld [vmem:[#allocation3 + $0x50] sm:$0xff]  ;;  %v1488_v45 = vld [vmem:[#allocation3 + $0x58] sm:$0xff]  ;;  %vm599_vm9 = vcmask 293888  }
  0x38   : > { %s1067_s26 = sshll.u32 %s369_s25, 3  ;;  %s1272_s12 = smov 112   ;;  %vm451_vm0 = vcmp.lt.s32.totalorder %v1439_v6, 1  ;;  %vm388_vm1 = vcmp.lt.s32.totalorder %v1439_v6, 17  ;;  %vm408_vm2 = vcmp.lt.s32.totalorder %v1439_v6, 16  ;;  %vm430_vm3 = vcmp.lt.s32.totalorder %v1439_v6, 15 }
  0x39   : > { %s372_s28 = scalar_lea.vmem %s1673_s0, %s1067_s26  ;;  %s1273_s9 = smov 113   ;;  %vm482_vm4 = vcmp.lt.s32.totalorder %v1439_v6, 127  ;;  %vm525_vm5 = vcmp.lt.s32.totalorder %v1439_v6, 112  ;;  %v1497_v53 = vld [vmem:[#allocation3 + $0x70] sm:$0xff]  ;;  %v1499_v54 = vld [vmem:[#allocation3 + $0x78] sm:$0xff]  ;;  %vm504_vm6 = vcmp.lt.s32.totalorder %v1439_v6, 113 }
  0x3a   : > { %v378_v0 = vld [vmem:[%s372_s28] sm:$0xff]  ;;  %s1274_s16 = smov 111   ;;  %v1508_v63 = vld [vmem:[#allocation3 + $0x60] sm:$0xff]  ;;  %vm547_vm7 = vcmp.lt.s32.totalorder %v1439_v6, 111  ;;  %vm877_vm10 = vcmask 1043456   ;;  %vm873_vm11 = vcmask 588800  }
  0x3b   : > { %447 = vrot.lane.b32.xlu1 %v378_v0, %s1267_s23  ;;  %404 = vrot.lane.b32.xlu0 %v378_v0, %s1268_s21  ;;  %v380_v1 = vcombine.high %v378_v0, %v378_v0  ;;  %v375_v6 = vld [vmem:[%s1675_s2] sm:$0xf]  ;;  %p1694_p9 = scmp.ne.s32.totalorder %s1687_s19, 0  ;;  %s1276_s25 = smov [#allocation6]  }
  0x3c   : > { %s1200_s26 = sshll.u32 %s1276_s25, 4  ;;  %s1201_s26 = int_to_ptr.vmem [resolvable:$false] %s1200_s26 }
  0x3d   : > { %v1072_v2 = vpack.c.bf16 %v380_v1, %v378_v0  ;;  %s1202_s27 = scalar_lea.vmem %s1201_s26, 512 }
  0x3f   : > { %382 = vrot.lane.b32.xlu0 %v378_v0, %s1269_s29  ;;  %449 = vrot.lane.b32.xlu1 %v380_v1, %s1267_s23  ;;  %477 = vst [vmem:[#allocation2 + $0x10] sm:$0x33] %v1072_v2 }
  0x43   : > { %384 = vrot.lane.b32.xlu1 %v380_v1, %s1269_s29  ;;  %406 = vrot.lane.b32.xlu0 %v380_v1, %s1268_s21 }
  0x47   : > { %428 = vrot.lane.b32.xlu1 %v380_v1, %s1270_s30  ;;  %426 = vrot.lane.b32.xlu0 %v378_v0, %s1270_s30 }
  0x4b   : > { %480 = vrot.lane.b32.xlu1 %v380_v1, %s1271_s11  ;;  %478 = vrot.lane.b32.xlu0 %v378_v0, %s1271_s11 }
  0x4f   : > { %523 = vrot.lane.b32.xlu1 %v380_v1, %s1272_s12  ;;  %521 = vrot.lane.b32.xlu0 %v378_v0, %s1272_s12 }
  0x53   : > { %502 = vrot.lane.b32.xlu1 %v380_v1, %s1273_s9  ;;  %500 = vrot.lane.b32.xlu0 %v378_v0, %s1273_s9 }
  0x57   : > { %545 = vrot.lane.b32.xlu1 %v380_v1, %s1274_s16  ;;  %543 = vrot.lane.b32.xlu0 %v378_v0, %s1274_s16  ;;  %v1510_v0 = vld [vmem:[#allocation3 + $0x68] sm:$0xff] }
  0x5b   : > { %571 = vperm.xlu0 %1148, %v376_v4  }
  0xad   : > { %v448_v7 = vpop.permute.xlu1 %447  ;;  %v405_v8 = vpop.permute.xlu0 %404 }
  0xb1   : > { %v383_v11 = vpop.permute.xlu0 %382  ;;  %v450_v12 = vpop.permute.xlu1 %449 }
  0xb2   : > { %v452_v13 = vsel %vm451_vm0, %v448_v7, %v450_v12  ;;  %v453_v14 = vsel %vm451_vm0, %v450_v12, %v448_v7 }
  0xb3   : > { %v457_v15 = vmul.f32 %v1442_v9, %v453_v14  ;;  %v458_v16 = vmul.f32 %v1444_v10, %v452_v13  ;;  %v1519_v14 = vld [vmem:[#allocation3 + $0x80] sm:$0xff] }
  0xb5   : > { %v1071_v20 = vpack.c.bf16 %v458_v16, %v457_v15  ;;  %v385_v21 = vpop.permute.xlu1 %384  ;;  %v407_v23 = vpop.permute.xlu0 %406  ;;  %v1521_v15 = vld [vmem:[#allocation3 + $0x88] sm:$0xff] }
  0xb6   : > { %v389_v24 = vsel %vm388_vm1, %v383_v11, %v385_v21  ;;  %v390_v25 = vsel %vm388_vm1, %v385_v21, %v383_v11  ;;  %v409_v26 = vsel %vm408_vm2, %v405_v8, %v407_v23  ;;  %v410_v27 = vsel %vm408_vm2, %v407_v23, %v405_v8 }
  0xb7   : > { %v466_v28 = vrot.slane %v1071_v20, 6  ;;  %v393_v29 = vmul.f32 %v1454_v17, %v390_v25  ;;  %v394_v30 = vmul.f32 %v1456_v18, %v389_v24  ;;  %v414_v31 = vmul.f32 %v1458_v19, %v410_v27 }
  0xb8   : > { %v415_v32 = vmul.f32 %v1460_v22, %v409_v26 }
  0xb9   : > { %468 = vst [vmem:[#allocation2 + $0x8] sm:$0xcc] %v466_v28  ;;  %v1068_v35 = vpack.c.bf16 %v394_v30, %v393_v29  ;;  %v429_v36 = vpop.permute.xlu1 %428  ;;  %v427_v37 = vpop.permute.xlu0 %426 }
  0xba   : > { %v1069_v38 = vpack.c.bf16 %v415_v32, %v414_v31  ;;  %v431_v39 = vsel %vm430_vm3, %v427_v37, %v429_v36  ;;  %v432_v40 = vsel %vm430_vm3, %v429_v36, %v427_v37  ;;  %v374_v36 = vld [vmem:[%s1674_s1] sm:$0xf] }
  0xbb   : > { %403 = vst [vmem:[#allocation2] sm:$0x33] %v1068_v35  ;;  %v436_v41 = vmul.f32 %v1475_v33, %v432_v40  ;;  %v437_v42 = vmul.f32 %v1477_v34, %v431_v39 }
  0xbc   : > { %v423_v43 = vrot.slane %v1069_v38, 6 }
  0xbd   : > { %v1070_v46 = vpack.c.bf16 %v437_v42, %v436_v41  ;;  %v481_v47 = vpop.permute.xlu1 %480  ;;  %v479_v48 = vpop.permute.xlu0 %478 }
  0xbe   : > { %425 = vst [vmem:[#allocation2] sm:$0xcc] %v423_v43  ;;  %v483_v49 = vsel %vm482_vm4, %v479_v48, %v481_v47  ;;  %v484_v50 = vsel %vm482_vm4, %v481_v47, %v479_v48 }
  0xbf   : > { %446 = vst [vmem:[#allocation2 + $0x8] sm:$0x33] %v1070_v46  ;;  %v488_v51 = vmul.f32 %v1486_v44, %v483_v49  ;;  %v489_v52 = vmul.f32 %v1488_v45, %v484_v50  ;;  %v377_v49 = vld [vmem:[%s1679_s6] sm:$0xff] }
  0xc1   : > { %v1073_v55 = vpack.c.bf16 %v489_v52, %v488_v51  ;;  %v524_v56 = vpop.permute.xlu1 %523  ;;  %v522_v57 = vpop.permute.xlu0 %521 }
  0xc2   : > { %v526_v58 = vsel %vm525_vm5, %v522_v57, %v524_v56  ;;  %v527_v59 = vsel %vm525_vm5, %v524_v56, %v522_v57 }
  0xc3   : > { %v497_v60 = vrot.slane %v1073_v55, 6  ;;  %v531_v61 = vmul.f32 %v1497_v53, %v526_v58  ;;  %v532_v62 = vmul.f32 %v1499_v54, %v527_v59 }
  0xc5   : > { %499 = vst [vmem:[#allocation2 + $0x10] sm:$0xcc] %v497_v60  ;;  %v1075_v1 = vpack.c.bf16 %v532_v62, %v531_v61  ;;  %v503_v2 = vpop.permute.xlu1 %502  ;;  %v501_v3 = vpop.permute.xlu0 %500 }
  0xc6   : > { %v505_v4 = vsel %vm504_vm6, %v501_v3, %v503_v2  ;;  %v506_v5 = vsel %vm504_vm6, %v503_v2, %v501_v3  ;;  %v1150_v7 = vld [vmem:[#allocation2 + $0x4] ss:$8 sps:$4 sm:$0xff]   ;;  %v1152_v8 = vld [vmem:[#allocation2] ss:$8 sps:$4 sm:$0xff]  }
  0xc7   : > { %v540_v11 = vrot.slane %v1075_v1, 6  ;;  %v510_v12 = vmul.f32 %v1508_v63, %v505_v4  ;;  %v511_v13 = vmul.f32 %v1510_v0, %v506_v5  ;;  %610 = vmatprep.subr.bf16.mxu0 %v1150_v7 }
  0xc8   : > { %611 = vmatpush1.bf16.msra.mxu0 %v1152_v8 }
  0xc9   : > { %542 = vst [vmem:[#allocation2 + $0x18] sm:$0xcc] %v540_v11  ;;  %v1074_v16 = vpack.c.bf16 %v511_v13, %v510_v12  ;;  %v546_v20 = vpop.permute.xlu1 %545  ;;  %v544_v21 = vpop.permute.xlu0 %543 }
  0xca   : > { %v548_v23 = vsel %vm547_vm7, %v544_v21, %v546_v20  ;;  %v549_v24 = vsel %vm547_vm7, %v546_v20, %v544_v21 }
  0xcb   : > { %520 = vst [vmem:[#allocation2 + $0x18] sm:$0x33] %v1074_v16  ;;  %v553_v25 = vmul.f32 %v1519_v14, %v548_v23  ;;  %v554_v26 = vmul.f32 %v1521_v15, %v549_v24 }
  0xcd   : > { %v1076_v27 = vpack.c.bf16 %v554_v26, %v553_v25 }
  0xcf   : > { %563 = vst [vmem:[#allocation2 + $0x20] sm:$0x33] %v1076_v27 }
  0xd2   : > { %v1153_v28 = vld [vmem:[#allocation2 + $0x14] ss:$8 sps:$4 sm:$0xff]   ;;  %v1155_v29 = vld [vmem:[#allocation2 + $0x10] ss:$8 sps:$4 sm:$0xff]  }
  0xd3   : > { %612 = vmatprep.subr.bf16.mxu0 %v1153_v28 }
  0xd4   : > { %613 = vmatpush1.bf16.msra.mxu0 %v1155_v29 }
  0xd6   : > { %v568_v30 = vld [vmem:[#allocation2 + $0x20] sm:$0x33] }
  0xd7   : > { %v1038_v31 = vcombine.high %v568_v30, %v568_v30  ;;  %v1037_v32 = vcombine.low %v568_v30, %v568_v30 }
  0xd9   : > { %1039 = vmatprep.subr.msk.bf16.mxu0 %vm603_vm8, %v1038_v31  ;;  %v605_v35 = vsel %vm603_vm8, %v1037_v32, 0 }
  0xda   : > { %615 = vmatpush1.bf16.msra.mxu0 %v605_v35  ;;  %v572_v37 = vpop.permute.xlu0 %571 }
  0xdd   : > { %1040 = vmatmul.mubr.msk.bf16.vlgmr.msra.gmra.mrb[0].mxu0 %vm599_vm9, %v374_v36 }
 0x1b0   : > { %v644_v38 = vpop.f32.mrb[0].mxu0 }
 0x1b1   : > { %v645_v39 = vadd.f32 %v644_v38, %v572_v37  ;;  %v646_v40 = vpop.f32.mrb[1].mxu0 }
 0x1b2   : > { %v647_v41 = vadd.f32 %v646_v40, %v572_v37  ;;  %v648_v42 = vpop.f32.mrb[2].mxu0 }
 0x1b3   : > { %v1532_v43 = vmax.f32 %v645_v39, 0.0  ;;  %v649_v46 = vpop.f32.mrb[3].mxu0 }
 0x1b4   : > { %v1534_v47 = vmax.f32 %v647_v41, 0.0 }
 0x1b5   : > { %672 = vrot.lane.b32.xlu0 %v1532_v43, %s1268_s21  ;;  %653 = vrot.lane.b32.xlu1 %v1532_v43, %s1269_s29 }
 0x1b6   : > { %v1081_v48 = vpack.c.bf16 %v1534_v47, %v1532_v43 }
 0x1b8   : > { %737 = vst [vmem:[#allocation2 + $0x20] sm:$0xff] %v1081_v48 }
 0x1b9   : > { %691 = vrot.lane.b32.xlu0 %v1532_v43, %s1270_s30  ;;  %655 = vrot.lane.b32.xlu1 %v1534_v47, %s1269_s29 }
 0x1bd   : > { %710 = vrot.lane.b32.xlu0 %v1532_v43, %s1267_s23  ;;  %674 = vrot.lane.b32.xlu1 %v1534_v47, %s1268_s21  ;;  %s365_s21 = sand.u32 1, %s1254_s5  }
 0x1be   : > { %s1021_s29 = sshll.u32 %s365_s21, 4 }
 0x1c1   : > { %738 = vrot.lane.b32.xlu0 %v1532_v43, %s1271_s11  ;;  %693 = vrot.lane.b32.xlu1 %v1534_v47, %s1270_s30  ;;  %s1086_s30 = sshll.u32 %s1353_s7, 8  ;;  %s930_s7 = scalar_lea.sflag [#allocation5], %s365_s21 }
 0x1c2   : > { %s1631_s17 = scalar_lea.hbm %s1683_s10, %s1086_s30 }
 0x1c5   : > { %757 = vrot.lane.b32.xlu0 %v1532_v43, %s1273_s9  ;;  %712 = vrot.lane.b32.xlu1 %v1534_v47, %s1267_s23 }
 0x1c9   : > { %776 = vrot.lane.b32.xlu0 %v1532_v43, %s1272_s12  ;;  %740 = vrot.lane.b32.xlu1 %v1534_v47, %s1271_s11  ;;  %s367_s11 = scalar_lea.vmem [#allocation6], %s1021_s29 }
 0x1cd   : > { %795 = vrot.lane.b32.xlu0 %v1532_v43, %s1274_s16  ;;  %759 = vrot.lane.b32.xlu1 %v1534_v47, %s1273_s9 }
 0x1d1   : > { %825 = vperm.xlu0 %1148, %v377_v49   ;;  %778 = vrot.lane.b32.xlu1 %v1534_v47, %s1272_s12  ;;  %s944_s12 = sshll.u32 %s367_s11, 4  ;;  %s1633_s12 = int_to_ptr.vmem [resolvable:$true] %s944_s12 }
 0x1d2   : > { %s1196_s22 = scalar_lea.vmem %s1633_s12, 256  ;;  %p1203_p2 = scmp.lt.s32.totalorder %s1633_s12, %s1201_s26 }
 0x1d3   : > { %p1197_p6 = scmp.ne.s32.totalorder %s1633_s12, %s1196_s22  ;;  %p1204_p3 = scmp.lt.s32.totalorder %s1202_s27, %s1196_s22 }
 0x1d5   : > { %797 = vrot.lane.b32.xlu1 %v1534_v47, %s1274_s16  ;;  %p1198_p10 = pnand %p1197_p6, %p1694_p9  ;;  %p1205_p4 = por %p1204_p3, %p1203_p2 }
 0x1d7   : > { %p1199_p12 = pneg %p1198_p10 }
 0x1d9   : > { %p1206_p7 = pnand %p1205_p4, %p1199_p12 }
 0x227   : > { %v673_v50 = vpop.permute.xlu0 %672  ;;  %v654_v51 = vpop.permute.xlu1 %653 }
 0x22b   : > { %v692_v52 = vpop.permute.xlu0 %691  ;;  %v656_v55 = vpop.permute.xlu1 %655 }
 0x22c   : > { %v657_v56 = vsel %vm388_vm1, %v654_v51, %v656_v55  ;;  %v658_v57 = vsel %vm388_vm1, %v656_v55, %v654_v51 }
 0x22d   : > { %v661_v58 = vmul.f32 %v658_v57, %v1454_v17  ;;  %v662_v59 = vmul.f32 %v657_v56, %v1456_v18 }
 0x22f   : > { %v1077_v60 = vpack.c.bf16 %v662_v59, %v661_v58  ;;  %v711_v61 = vpop.permute.xlu0 %710  ;;  %v675_v62 = vpop.permute.xlu1 %674 }
 0x230   : > { %v676_v1 = vsel %vm408_vm2, %v673_v50, %v675_v62  ;;  %v677_v2 = vsel %vm408_vm2, %v675_v62, %v673_v50 }
 0x231   : > { %671 = vst [vmem:[#allocation2] sm:$0xff] %v1077_v60  ;;  %v680_v3 = vmul.f32 %v677_v2, %v1458_v19  ;;  %v681_v4 = vmul.f32 %v676_v1, %v1460_v22 }
 0x233   : > { %v1078_v5 = vpack.c.bf16 %v681_v4, %v680_v3  ;;  %v694_v7 = vpop.permute.xlu1 %693  ;;  %v739_v8 = vpop.permute.xlu0 %738  ;;  %v1158_v13 = vpack.c.bf16 %v681_v4, %v662_v59  ;;  %v1159_v16 = vpack.c.bf16 %v680_v3, %v661_v58 }
 0x234   : > { %v695_v17 = vsel %vm430_vm3, %v692_v52, %v694_v7  ;;  %v696_v18 = vsel %vm430_vm3, %v694_v7, %v692_v52 }
 0x235   : > { %690 = vst [vmem:[#allocation2 + $0x8] sm:$0xff] %v1078_v5  ;;  %v699_v11 = vmul.f32 %v696_v18, %v1475_v33  ;;  %v700_v12 = vmul.f32 %v695_v17, %v1477_v34  ;;  %884 = vmatprep.subr.bf16.mxu1 %v1158_v13 }
 0x236   : > { %885 = vmatpush1.bf16.msra.mxu1 %v1159_v16 }
 0x237   : > { %v1079_v20 = vpack.c.bf16 %v700_v12, %v699_v11  ;;  %v713_v19 = vpop.permute.xlu1 %712  ;;  %v758_v33 = vpop.permute.xlu0 %757 }
 0x238   : > { %v714_v22 = vsel %vm451_vm0, %v711_v61, %v713_v19  ;;  %v715_v21 = vsel %vm451_vm0, %v713_v19, %v711_v61 }
 0x239   : > { %709 = vst [vmem:[#allocation2 + $0x10] sm:$0xff] %v1079_v20  ;;  %v718_v23 = vmul.f32 %v715_v21, %v1442_v9  ;;  %v719_v24 = vmul.f32 %v714_v22, %v1444_v10 }
 0x23b   : > { %v1080_v25 = vpack.c.bf16 %v719_v24, %v718_v23  ;;  %v741_v34 = vpop.permute.xlu1 %740  ;;  %v1160_v30 = vpack.c.bf16 %v719_v24, %v700_v12  ;;  %v1161_v31 = vpack.c.bf16 %v718_v23, %v699_v11  ;;  %v777_v35 = vpop.permute.xlu0 %776 }
 0x23c   : > { %v742_v26 = vsel %vm482_vm4, %v739_v8, %v741_v34  ;;  %v743_v27 = vsel %vm482_vm4, %v741_v34, %v739_v8 }
 0x23d   : > { %728 = vst [vmem:[#allocation2 + $0x18] sm:$0xff] %v1080_v25  ;;  %v746_v28 = vmul.f32 %v742_v26, %v1486_v44  ;;  %v747_v29 = vmul.f32 %v743_v27, %v1488_v45  ;;  %886 = vmatprep.subr.bf16.mxu1 %v1160_v30 }
 0x23e   : > { %887 = vmatpush1.bf16.msra.mxu1 %v1161_v31 }
 0x23f   : > { %v760_v32 = vpop.permute.xlu1 %759  ;;  %v1162_v44 = vpack.c.bf16 %v747_v29, %v1534_v47  ;;  %v1163_v45 = vpack.c.bf16 %v746_v28, %v1532_v43 }
 0x240   : > { %v761_v9 = vsel %vm504_vm6, %v758_v33, %v760_v32  ;;  %v762_v10 = vsel %vm504_vm6, %v760_v32, %v758_v33 }
 0x241   : > { %v765_v36 = vmul.f32 %v761_v9, %v1508_v63  ;;  %v766_v37 = vmul.f32 %v762_v10, %v1510_v0  ;;  %888 = vmatprep.subr.bf16.mxu1 %v1162_v44  ;;  %v796_v63 = vpop.permute.xlu0 %795 }
 0x242   : > { %889 = vmatpush1.bf16.msra.mxu1 %v1163_v45 }
 0x243   : > { %v779_v38 = vpop.permute.xlu1 %778 }
 0x244   : > { %v780_v39 = vsel %vm525_vm5, %v777_v35, %v779_v38  ;;  %v781_v40 = vsel %vm525_vm5, %v779_v38, %v777_v35 }
 0x245   : > { %v784_v41 = vmul.f32 %v780_v39, %v1497_v53  ;;  %v785_v42 = vmul.f32 %v781_v40, %v1499_v54 }
 0x247   : > { %v798_v46 = vpop.permute.xlu1 %797  ;;  %v1164_v49 = vpack.c.bf16 %v785_v42, %v766_v37  ;;  %v1165_v50 = vpack.c.bf16 %v784_v41, %v765_v36 }
 0x248   : > { %v799_v0 = vsel %vm547_vm7, %v796_v63, %v798_v46  ;;  %v800_v43 = vsel %vm547_vm7, %v798_v46, %v796_v63 }
 0x249   : > { %v803_v47 = vmul.f32 %v799_v0, %v1519_v14  ;;  %v804_v48 = vmul.f32 %v800_v43, %v1521_v15  ;;  %890 = vmatprep.subr.bf16.mxu1 %v1164_v49 }
 0x24a   : > { %891 = vmatpush1.bf16.msra.mxu1 %v1165_v50 }
 0x24b   : > { %v1166_v53 = vpack.c.bf16 %v804_v48, %v804_v48  ;;  %v1167_v54 = vpack.c.bf16 %v803_v47, %v803_v47 }
 0x24d   : > { %1060 = vmatprep.subr.msk.bf16.mxu1 %vm877_vm10, %v1166_v53  ;;  %v879_v51 = vsel %vm877_vm10, %v1167_v54, 0 }
 0x24e   : > { %893 = vmatpush1.bf16.msra.mxu1 %v879_v51 }
 0x250   : > { %v826_v14 = vpop.permute.xlu0 %825 }
 0x251   : > { %1061 = vmatmul.mubr.msk.bf16.vlgmr.msra.gmra.mrb[0].mxu1 %vm873_vm11, %v375_v6 }
 0x324   : > { %v918_v15 = vpop.f32.mrb[0].mxu1 }
 0x325   : > { %v919_v52 = vadd.f32 %v918_v15, %v826_v14  ;;  %v920_v55 = vpop.f32.mrb[1].mxu1 }
 0x326   : > { %v921_v56 = vadd.f32 %v920_v55, %v826_v14  ;;  %v922_v57 = vpop.f32.mrb[2].mxu1 }
 0x327   : > { %v925_v58 = vmax.f32 %v919_v52, 0.0  ;;  %v923_v59 = vpop.f32.mrb[3].mxu1 }
 0x328   : > { %v926_v60 = vmax.f32 %v921_v56, 0.0 }
 0x329   : > { %927 = vst [vmem:[%s367_s11] sm:$0xff] %v925_v58 }
 0x32a   : > { %928 = vst [vmem:[%s367_s11 + $0x8] sm:$0xff] %v926_v60 }
 0x32b   : > { %1209 = shalt.err (!%p1206_p7)
}
 0x32c   : > { %s1210_s24 = scalar_lea.hbm %s1631_s17, 256  ;;  %s1214_s21 = scalar_lea.hbm %s1683_s10, 512 }
 0x32d   : > { %p1211_p8 = scmp.ne.s32.totalorder %s1631_s17, %s1210_s24  ;;  %p1215_p1 = scmp.lt.u32.totalorder %s1631_s17, %s1683_s10 }
 0x32e   : > { %p1216_p0 = scmp.lt.u32.totalorder %s1214_s21, %s1210_s24  ;;  %p1218_p6 = scmp.lt.u32.totalorder %s1210_s24, %s1631_s17 }
 0x32f   : > { %p1212_p11 = pnand %p1211_p8, %p1694_p9 }
 0x330   : > { %p1217_p5 = por %p1216_p0, %p1215_p1 }
 0x331   : > { %p1213_p13 = pneg %p1212_p11 }
 0x332   : > { %p1219_p10 = por %p1218_p6, %p1217_p5 }
 0x334   : > { %p1220_p12 = pnand %p1219_p10, %p1213_p13 }
 0x336   : > { %1223 = shalt.err (!%p1220_p12)
}
 0x337   : > { %1091 = dma.vmem_to_hbm [thread:$0]  (%p1694_p9), %s1633_s12, 256, %s1631_s17, %s930_s7  }
 0x338 PF: > { %p1103_p2 = scmp.ge.s32.totalorder %s1262_s14, 2  ;;  %s956_s11 = sand.u32 1, %s1250_s4  }
 0x339   : > { %p1695_p3 = scmp.ne.s32.totalorder %s1688_s20, 0  ;;  %s957_s9 = scalar_lea.sflag [#allocation5], %s956_s11 }
 0x33b   : > { %p1098_p4 = pnand %p1103_p2, %p1695_p3 }
 0x33d   : > { %1245 = dma.done.wait (!%p1098_p4), %s957_s9, 256  }
 0x33e   : > { %1247 = vsyncadd (!%p1098_p4), %s957_s9, 4294967040  ;;  %p21_p7 = scmp.ge.s32.totalorder %s1357_s15, 4   ;;  %s1696_s4 = smov %s1254_s5 }
 0x33f   : > { %s1697_s5 = smov %s1258_s13  ;;  %s1698_s13 = smov %s1368_s18 }
 0x340   : > { %s1699_s14 = smov %s1357_s15  ;;  %23 = sbr.rel (!%p21_p7) target bundleno = 4 (0x4), region = 107 }
 0x347   :  { %962 = vsyncpa [#allocation4], 1 }
 0x348   :  { %964 = vsyncpa [#allocation4 + $0x1], 1 }
 0x349   :  { %965 = vsyncpa [#allocation5], 1 }
 0x34a   :  { %967 = vsyncpa [#allocation5 + $0x1], 1 }

</bundles_post_ra>
